<compile_context>
chip_gen: v7x
topology: tpu7x:2x2x1
jax: 0.10.0
libtpu: 0.0.40
codegen_flags: <defaults>
</compile_context>

<pallas_src>
import functools
import math
import numpy as np

import jax
import jax.numpy as jnp
from jax.experimental import pallas as pl
from jax.experimental.pallas import tpu as pltpu


# --------------------------------------------------------------------------
# Deterministic parameter construction (librosa.filters.mel re-implemented,
# slaney scale + slaney norm, htk=False — the librosa defaults used by the
# PyTorch module).
# --------------------------------------------------------------------------
def _hz_to_mel(f):
    f = np.asarray(f, dtype=np.float64)
    f_sp = 200.0 / 3.0
    mels = f / f_sp
    min_log_hz = 1000.0
    min_log_mel = min_log_hz / f_sp
    logstep = np.log(6.4) / 27.0
    return np.where(
        f >= min_log_hz,
        min_log_mel + np.log(np.maximum(f, min_log_hz) / min_log_hz) / logstep,
        mels,
    )


def _mel_to_hz(m):
    m = np.asarray(m, dtype=np.float64)
    f_sp = 200.0 / 3.0
    freqs = f_sp * m
    min_log_hz = 1000.0
    min_log_mel = min_log_hz / f_sp
    logstep = np.log(6.4) / 27.0
    return np.where(
        m >= min_log_mel,
        min_log_hz * np.exp(logstep * (m - min_log_mel)),
        freqs,
    )


def _mel_filterbank(sr, n_fft, n_mels, fmin, fmax):
    n_freq = n_fft // 2 + 1
    fftfreqs = np.linspace(0.0, sr / 2.0, n_freq)
    mel_pts = np.linspace(_hz_to_mel(fmin), _hz_to_mel(fmax), n_mels + 2)
    mel_f = _mel_to_hz(mel_pts)
    fdiff = np.diff(mel_f)
    ramps = mel_f[:, None] - fftfreqs[None, :]
    weights = np.zeros((n_mels, n_freq), dtype=np.float64)
    for i in range(n_mels):
        lower = -ramps[i] / fdiff[i]
        upper = ramps[i + 2] / fdiff[i + 1]
        weights[i] = np.maximum(0.0, np.minimum(lower, upper))
    enorm = 2.0 / (mel_f[2 : n_mels + 2] - mel_f[:n_mels])
    weights *= enorm[:, None]
    return weights.astype(np.float32)


def _hamming_window(win_length):
    # torch.hamming_window(win_length, periodic=False)
    n = np.arange(win_length, dtype=np.float64)
    return 0.54 - 0.46 * np.cos(2.0 * np.pi * n / (win_length - 1))


# --------------------------------------------------------------------------
# Pallas kernel: per-batch-item framing + mel-spectrogram + per_feature norm.
#
#   seq_ref  : [B]               int32 SMEM (scalar prefetch: valid frame counts)
#   slab_ref : [1, t_c+1, hop]   bf16  hop-strided signal slab
#   wa_ref   : [hop, n_fft]      bf16  windowed DFT weights, first half-frame
#   wb_ref   : [hop, n_fft]      bf16  windowed DFT weights, second half-frame
#   fbt_ref  : [n_fft, nfilt]    bf16  mel filterbank (duplicated over 2F-2 axis)
#   out_ref  : [1, nfilt, t_out] f32   PyTorch output layout
# --------------------------------------------------------------------------
def _fbank_kernel(log_feats, seq_ref, slab_ref, wa_ref, wb_ref, fbt_ref, out_ref):
    b = pl.program_id(0)
    sl = seq_ref[b]                                  # valid frame count (int32)

    n_rows = slab_ref.shape[1]
    t_c = n_rows - 1                                 # frames computed (mult. of 8)
    ha = slab_ref[0, 0:t_c, :]                       # frame first halves  [t_c, hop]
    hb = slab_ref[0, 1:n_rows, :]                    # frame second halves [t_c, hop]

    # windowed one-sided DFT (cos rows + non-zero sin rows stacked on lanes)
    cs = (jnp.dot(ha, wa_ref[...], preferred_element_type=jnp.float32)
          + jnp.dot(hb, wb_ref[...], preferred_element_type=jnp.float32))  # [t_c, n_fft] f32
    sq = (cs * cs).astype(jnp.bfloat16)              # re^2 / im^2 columns

    # mel projection; fb duplicated over the stacked axis sums re^2+im^2
    mel = jnp.dot(sq, fbt_ref[...], preferred_element_type=jnp.float32)    # [t_c, nfilt]
    feats = jnp.log(mel + 1e-20) if log_feats else mel

    # per_feature normalization over valid frames only (unbiased std, +1e-5),
    # exactly matching torch (no guard on n-1; sl==1 gives nan like torch).
    t_idx = jax.lax.broadcasted_iota(jnp.int32, (t_c, 1), 0)
    valid = t_idx < sl                               # [t_c, 1]
    n = sl.astype(jnp.float32)
    xm = jnp.where(valid, feats, 0.0)
    mean = jnp.sum(xm, axis=0, keepdims=True) / n    # [1, nfilt]
    d = jnp.where(valid, feats - mean, 0.0)
    var = jnp.sum(d * d, axis=0, keepdims=True) / (n - 1.0)
    inv_std = pl.reciprocal(jnp.sqrt(var) + 1e-5, approx=False)            # [1, nfilt]
    outt = d * inv_std                               # zero where t >= sl (seq mask)

    # small [t_c, nfilt] tile -> [nfilt, t_out] (XLU transpose), store directly
    t_out = out_ref.shape[-1]
    out_ref[0] = outt.T[:, 0:t_out].astype(out_ref.dtype)


# --------------------------------------------------------------------------
# Module wrapper.
# --------------------------------------------------------------------------
class FilterbankFeaturesPallas:
    def __init__(self, sample_rate=8000, window_size=0.02, window_stride=0.01,
                 window="hamming", normalize="per_feature", n_fft=None,
                 preemph=0.97, nfilt=64, lowfreq=0, highfreq=None, log=True,
                 dither=1e-5, pad_to=8, max_duration=16.7, frame_splicing=1):
        assert window == "hamming", "only hamming window implemented"
        assert normalize == "per_feature", "only per_feature normalization implemented"
        assert frame_splicing == 1  # TODO(synk): splice_frames (frame_splicing>1) not implemented
        assert pad_to > 0           # TODO(synk): pad_to<0 (max_length padding) path not implemented

        self.win_length = int(sample_rate * window_size)
        self.hop_length = int(sample_rate * window_stride)
        self.n_fft = n_fft or 2 ** math.ceil(math.log2(self.win_length))
        # in-kernel framing relies on 50% frame overlap (true for the defaults)
        assert self.win_length == 2 * self.hop_length, \
            "in-kernel framing requires hop == win_length/2"  # TODO(synk): general hop
        self.log = log
        self.dither = dither
        self.nfilt = nfilt
        self.preemph = preemph
        self.pad_to = pad_to
        highfreq = highfreq or sample_rate / 2

        n_freq = self.n_fft // 2 + 1
        self.n_freq = n_freq
        K, hop = self.win_length, self.hop_length

        # Hamming window folded into the one-sided DFT matrix.  torch.stft
        # centres the win_length window inside the n_fft frame; we frame only
        # the win_length non-zero samples and keep the phase offset `left` in
        # the DFT angle (the power spectrum is identical either way).
        win = _hamming_window(K)                                     # [K] f64
        left = (self.n_fft - K) // 2
        self.left = left
        n_pos = left + np.arange(K, dtype=np.float64)                # [K]
        k = np.arange(n_freq, dtype=np.float64)                      # [F]
        ang = 2.0 * np.pi * np.outer(k, n_pos) / self.n_fft          # [F, K]
        cos_w = np.cos(ang) * win[None, :]
        sin_w = np.sin(ang) * win[None, :]
        # sin rows for k=0 and k=n_fft/2 are identically zero (integer phase)
        # -> drop them: stacked spectral axis becomes exactly n_fft = 2F-2.
        stacked = np.concatenate([cos_w, sin_w[1:n_freq - 1]], axis=0)   # [n_fft, K]
        w_t = stacked.T.astype(np.float32)                               # [K, n_fft]
        # split into the two half-frame weight blocks; bf16 MXU operands
        self.w_a = jnp.asarray(w_t[:hop], dtype=jnp.bfloat16)            # [hop, n_fft]
        self.w_b = jnp.asarray(w_t[hop:], dtype=jnp.bfloat16)            # [hop, n_fft]

        # mel filterbank duplicated along the stacked axis so the mel matmul
        # sums re^2 + im^2 implicitly; bf16 operand, f32 accumulation.
        fb = _mel_filterbank(sample_rate, self.n_fft, nfilt, lowfreq, highfreq)  # [nfilt, F]
        fb2 = np.concatenate([fb, fb[:, 1:n_freq - 1]], axis=1)          # [nfilt, n_fft]
        self.fb_t = jnp.asarray(fb2.T, dtype=jnp.bfloat16)               # [n_fft, nfilt]

    def __call__(self, x, seq_len, dither_key):
        B, L = x.shape
        n_fft, hop, nfilt = self.n_fft, self.hop_length, self.nfilt

        # get_seq_len: ceil(len / hop)
        seq_frames = jnp.ceil(seq_len.astype(jnp.float32) / hop).astype(jnp.int32)

        # dither + pre-emphasis in f32 on the (small) raw signal; XLA fuses
        # these into one pass.  Kept host-side (not folded into the DFT
        # weights) so the reflect-padded boundary frames match torch exactly.
        if self.dither > 0:
            x = x + self.dither * jax.random.normal(dither_key, x.shape, dtype=x.dtype)
        if self.preemph is not None:
            x = jnp.concatenate([x[:, :1], x[:, 1:] - self.preemph * x[:, :-1]], axis=1)

        # torch.stft(center=True): reflect-pad by n_fft//2.
        # TODO(synk): torch's x.shape[-1] < n_fft zero-pad special case not implemented.
        pad = n_fft // 2
        xp = jnp.pad(x, ((0, 0), (pad, pad)), mode="reflect")
        T = 1 + (xp.shape[1] - n_fft) // hop

        # pad_to padding, exactly like torch's nn.functional.pad(x, (0, pad_to - T%pad_to))
        # (torch adds a full extra pad_to when T is already a multiple).
        t_out = T + (self.pad_to - T % self.pad_to)
        t_c = ((t_out + 7) // 8) * 8              # kernel frame count (sublane aligned)

        # In-kernel framing input: hop-strided slab  slab[b, t, j] = xp[b, left + t*hop + j].
        # Pure slice+reshape of the contiguous signal (no gather, ~1x signal bytes).
        n_rows = t_c + 1
        need = self.left + n_rows * hop
        if need > xp.shape[1]:
            xp = jnp.pad(xp, ((0, 0), (0, need - xp.shape[1])))
        slab = xp[:, self.left:need].reshape(B, n_rows, hop)
        slab = slab.astype(jnp.bfloat16)          # halve DMA; bf16 MXU, f32 accumulate

        grid_spec = pltpu.PrefetchScalarGridSpec(
            num_scalar_prefetch=1,
            grid=(B,),
            in_specs=[
                pl.BlockSpec((1, n_rows, hop), lambda b, sl: (b, 0, 0)),
                pl.BlockSpec((hop, n_fft), lambda b, sl: (0, 0)),
                pl.BlockSpec((hop, n_fft), lambda b, sl: (0, 0)),
                pl.BlockSpec((n_fft, nfilt), lambda b, sl: (0, 0)),
            ],
            out_specs=pl.BlockSpec((1, nfilt, t_out), lambda b, sl: (b, 0, 0)),
        )

        # rough per-step VMEM residency -> raise the scoped-VMEM limit (v5e
        # defaults to 16 MiB) while staying well inside v7x's 64 MiB physical.
        est = (2 * (n_rows * hop * 2 + nfilt * t_out * 4
                    + (2 * hop * n_fft + n_fft * nfilt) * 2)
               + t_c * n_fft * 8 + t_c * nfilt * 32)
        vmem_limit = int(min(max(3 * est, 32 * 2**20), 48 * 2**20))

        out = pl.pallas_call(
            functools.partial(_fbank_kernel, bool(self.log)),
            out_shape=jax.ShapeDtypeStruct((B, nfilt, t_out), jnp.float32),
            grid_spec=grid_spec,
            compiler_params=pltpu.CompilerParams(
                dimension_semantics=("parallel",),
                vmem_limit_bytes=vmem_limit),
        )(seq_frames, slab, self.w_a, self.w_b, self.fb_t)

        # TODO(synk): T-tiled two-pass normalization (adds a second "parallel"
        #             grid axis) for very long clips / B==1 on v7x dual-TC.
        return out


if __name__ == "__main__":
    key = jax.random.PRNGKey(0)
    k_x, k_dither = jax.random.split(key)

    # small config: sample_rate=1600 -> win_length=32, hop=16, n_fft=32, 17 bins
    B, L = 2, 256
    fbank = FilterbankFeaturesPallas(sample_rate=1600, window_size=0.02,
                                     window_stride=0.01, nfilt=16)

    x = jax.random.normal(k_x, (B, L), dtype=jnp.float32)
    seq_len = jnp.array([256, 200], dtype=jnp.int32)   # raw sample lengths

    out = fbank(x, seq_len, k_dither)
    out = jax.block_until_ready(out)
    assert out.shape == (B, 16, 24), out.shape          # T=17 padded to 24 (pad_to=8)
    assert bool(jnp.all(jnp.isfinite(out)))
    print("KERNEL_OK")
</pallas_src>

<mosaic_0001>
module attributes {stable_mosaic.version = 11 : i64} {
  func.func @_fbank_kernel(%arg0: i32, %arg1: memref<2xi32, #tpu.memory_space<smem>>, %arg2: memref<1x25x16xbf16, #tpu.memory_space<vmem>>, %arg3: memref<16x32xbf16, #tpu.memory_space<vmem>>, %arg4: memref<16x32xbf16, #tpu.memory_space<vmem>>, %arg5: memref<32x16xbf16, #tpu.memory_space<vmem>>, %arg6: memref<1x16x24xf32, #tpu.memory_space<vmem>>) attributes {dimension_semantics = [#tpu.dimension_semantics<parallel>], iteration_bounds = array<i64: 2>, scalar_prefetch = 1 : i64, scratch_operands = 0 : i64, tpu.core_type = #tpu.core_type<tc>, window_params = [{transform_indices = @transform_0, window_bounds = array<i64: 1, 25, 16>}, {pipeline_mode = #tpu.pipeline_mode<synchronous>, transform_indices = @transform_1, window_bounds = array<i64: 16, 32>}, {pipeline_mode = #tpu.pipeline_mode<synchronous>, transform_indices = @transform_2, window_bounds = array<i64: 16, 32>}, {pipeline_mode = #tpu.pipeline_mode<synchronous>, transform_indices = @transform_3, window_bounds = array<i64: 32, 16>}, {transform_indices = @transform_4, window_bounds = array<i64: 1, 16, 24>}]} {
    %0 = arith.index_cast %arg0 : i32 to index
    %1 = memref.load %arg1[%0] : memref<2xi32, #tpu.memory_space<smem>>
    %c0 = arith.constant 0 : index
    %c0_0 = arith.constant 0 : index
    %c0_1 = arith.constant 0 : index
    %2 = vector.load %arg2[%c0, %c0_0, %c0_1] : memref<1x25x16xbf16, #tpu.memory_space<vmem>>, vector<1x24x16xbf16>
    %3 = vector.shape_cast %2 : vector<1x24x16xbf16> to vector<24x16xbf16>
    %c0_2 = arith.constant 0 : index
    %c1 = arith.constant 1 : index
    %c0_3 = arith.constant 0 : index
    %4 = vector.load %arg2[%c0_2, %c1, %c0_3] : memref<1x25x16xbf16, #tpu.memory_space<vmem>>, vector<1x24x16xbf16>
    %5 = vector.shape_cast %4 : vector<1x24x16xbf16> to vector<24x16xbf16>
    %c0_4 = arith.constant 0 : index
    %c0_5 = arith.constant 0 : index
    %6 = vector.load %arg3[%c0_4, %c0_5] : memref<16x32xbf16, #tpu.memory_space<vmem>>, vector<16x32xbf16>
    %cst = arith.constant dense<0.000000e+00> : vector<24x32xf32>
    %7 = tpu.matmul %3, %6, %cst {dimension_numbers = #tpu.dot_dimension_numbers<[1], [0], [0], [1], [0, 0, 1, 1], [], []>} : vector<24x16xbf16>, vector<16x32xbf16>, vector<24x32xf32> -> vector<24x32xf32>
    %c0_6 = arith.constant 0 : index
    %c0_7 = arith.constant 0 : index
    %8 = vector.load %arg4[%c0_6, %c0_7] : memref<16x32xbf16, #tpu.memory_space<vmem>>, vector<16x32xbf16>
    %cst_8 = arith.constant dense<0.000000e+00> : vector<24x32xf32>
    %9 = tpu.matmul %5, %8, %cst_8 {dimension_numbers = #tpu.dot_dimension_numbers<[1], [0], [0], [1], [0, 0, 1, 1], [], []>} : vector<24x16xbf16>, vector<16x32xbf16>, vector<24x32xf32> -> vector<24x32xf32>
    %10 = arith.addf %7, %9 : vector<24x32xf32>
    %11 = arith.mulf %10, %10 : vector<24x32xf32>
    %12 = arith.truncf %11 : vector<24x32xf32> to vector<24x32xbf16>
    %c0_9 = arith.constant 0 : index
    %c0_10 = arith.constant 0 : index
    %13 = vector.load %arg5[%c0_9, %c0_10] : memref<32x16xbf16, #tpu.memory_space<vmem>>, vector<32x16xbf16>
    %cst_11 = arith.constant dense<0.000000e+00> : vector<24x16xf32>
    %14 = tpu.matmul %12, %13, %cst_11 {dimension_numbers = #tpu.dot_dimension_numbers<[1], [0], [0], [1], [0, 0, 1, 1], [], []>} : vector<24x32xbf16>, vector<32x16xbf16>, vector<24x16xf32> -> vector<24x16xf32>
    %cst_12 = arith.constant 9.99999968E-21 : f32
    %15 = vector.broadcast %cst_12 : f32 to vector<24x16xf32>
    %16 = arith.addf %14, %15 : vector<24x16xf32>
    %17 = math.log %16 : vector<24x16xf32>
    %18 = tpu.iota {dimensions = array<i32: 0>} : vector<24x1xi32>
    %19 = vector.broadcast %1 : i32 to vector<24x1xi32>
    %20 = arith.cmpi slt, %18, %19 : vector<24x1xi32>
    %21 = arith.sitofp %1 : i32 to f32
    %cst_13 = arith.constant 0.000000e+00 : f32
    %22 = vector.shape_cast %20 : vector<24x1xi1> to vector<24x1xi1>
    %23 = vector.broadcast %22 : vector<24x1xi1> to vector<24x16xi1>
    %24 = vector.broadcast %cst_13 : f32 to vector<24x16xf32>
    %25 = arith.select %23, %17, %24 : vector<24x16xi1>, vector<24x16xf32>
    %cst_14 = arith.constant dense<0.000000e+00> : vector<16xf32>
    %26 = vector.multi_reduction <add>, %25, %cst_14 [0] : vector<24x16xf32> to vector<16xf32>
    %27 = vector.shape_cast %26 : vector<16xf32> to vector<1x16xf32>
    %28 = vector.broadcast %21 : f32 to vector<1x16xf32>
    %29 = arith.divf %27, %28 : vector<1x16xf32>
    %30 = vector.broadcast %29 : vector<1x16xf32> to vector<24x16xf32>
    %31 = arith.subf %17, %30 : vector<24x16xf32>
    %cst_15 = arith.constant 0.000000e+00 : f32
    %32 = vector.shape_cast %20 : vector<24x1xi1> to vector<24x1xi1>
    %33 = vector.broadcast %32 : vector<24x1xi1> to vector<24x16xi1>
    %34 = vector.broadcast %cst_15 : f32 to vector<24x16xf32>
    %35 = arith.select %33, %31, %34 : vector<24x16xi1>, vector<24x16xf32>
    %36 = arith.mulf %35, %35 : vector<24x16xf32>
    %cst_16 = arith.constant dense<0.000000e+00> : vector<16xf32>
    %37 = vector.multi_reduction <add>, %36, %cst_16 [0] : vector<24x16xf32> to vector<16xf32>
    %38 = vector.shape_cast %37 : vector<16xf32> to vector<1x16xf32>
    %cst_17 = arith.constant 1.000000e+00 : f32
    %39 = arith.subf %21, %cst_17 : f32
    %40 = vector.broadcast %39 : f32 to vector<1x16xf32>
    %41 = arith.divf %38, %40 : vector<1x16xf32>
    %42 = math.sqrt %41 : vector<1x16xf32>
    %cst_18 = arith.constant 9.99999974E-6 : f32
    %43 = vector.broadcast %cst_18 : f32 to vector<1x16xf32>
    %44 = arith.addf %42, %43 : vector<1x16xf32>
    %45 = tpu.reciprocal %44 : vector<1x16xf32> -> vector<1x16xf32>
    %46 = vector.broadcast %45 : vector<1x16xf32> to vector<24x16xf32>
    %47 = arith.mulf %35, %46 : vector<24x16xf32>
    %48 = tpu.transpose %47, [1, 0] : vector<24x16xf32> -> vector<16x24xf32>
    %c0_19 = arith.constant 0 : index
    %c0_20 = arith.constant 0 : index
    %c0_21 = arith.constant 0 : index
    %49 = vector.load %arg6[%c0_19, %c0_20, %c0_21] : memref<1x16x24xf32, #tpu.memory_space<vmem>>, vector<1x16x24xf32>
    %50 = vector.shape_cast %49 : vector<1x16x24xf32> to vector<16x24xf32>
    %51 = vector.shape_cast %48 : vector<16x24xf32> to vector<1x16x24xf32>
    tpu.vector_store %arg6[%c0_19, %c0_20, %c0_21], %51 {strides = array<i32>} : memref<1x16x24xf32, #tpu.memory_space<vmem>>, vector<1x16x24xf32>,
    return
  }
  func.func @transform_0(%arg0: i32, %arg1: memref<2xi32, #tpu.memory_space<smem>>) -> (i32, i32, i32) {
    %c0_i32 = arith.constant 0 : i32
    %c0_i32_0 = arith.constant 0 : i32
    %c0_i32_1 = arith.constant 0 : i32
    return %arg0, %c0_i32, %c0_i32_0 : i32, i32, i32
  }
  func.func @transform_1(%arg0: i32, %arg1: memref<2xi32, #tpu.memory_space<smem>>) -> (i32, i32) {
    %c0_i32 = arith.constant 0 : i32
    %c0_i32_0 = arith.constant 0 : i32
    %c0_i32_1 = arith.constant 0 : i32
    return %c0_i32, %c0_i32_0 : i32, i32
  }
  func.func @transform_2(%arg0: i32, %arg1: memref<2xi32, #tpu.memory_space<smem>>) -> (i32, i32) {
    %c0_i32 = arith.constant 0 : i32
    %c0_i32_0 = arith.constant 0 : i32
    %c0_i32_1 = arith.constant 0 : i32
    return %c0_i32, %c0_i32_0 : i32, i32
  }
  func.func @transform_3(%arg0: i32, %arg1: memref<2xi32, #tpu.memory_space<smem>>) -> (i32, i32) {
    %c0_i32 = arith.constant 0 : i32
    %c0_i32_0 = arith.constant 0 : i32
    %c0_i32_1 = arith.constant 0 : i32
    return %c0_i32, %c0_i32_0 : i32, i32
  }
  func.func @transform_4(%arg0: i32, %arg1: memref<2xi32, #tpu.memory_space<smem>>) -> (i32, i32, i32) {
    %c0_i32 = arith.constant 0 : i32
    %c0_i32_0 = arith.constant 0 : i32
    %c0_i32_1 = arith.constant 0 : i32
    return %arg0, %c0_i32, %c0_i32_0 : i32, i32, i32
  }
}

</mosaic_0001>

<bundles_post_ra>
// kernel: tpu_custom_call.1
= control target key start
LH: loop header
LB: loop body
LE: loop exit
PB: predicated region body
PF: predicated region fallthrough
CT: control target
= control target key end

     0   :  { %s998_s0 = inlined_call_operand.vmem [shape: s32[2], index: 0, kind: input, shape index: {}]   ;;  %s999_s1 = inlined_call_operand.vmem [shape: bf16[2,25,16], index: 1, kind: input, shape index: {}]   ;;  %s1000_s2 = inlined_call_operand.vmem [shape: bf16[16,32], index: 2, kind: input, shape index: {}]   ;;  %s1001_s3 = inlined_call_operand.vmem [shape: bf16[16,32], index: 3, kind: input, shape index: {}]   ;;  %s1002_s4 = inlined_call_operand.vmem [shape: bf16[32,16], index: 4, kind: input, shape index: {}]   ;;  %s1003_s5 = inlined_call_operand.hbm [shape: f32[2,16,24], index: 5, kind: output, shape index: {}]  }
   0x1   :  { %s10_s20 = sshll.u32 %s998_s0, 4  ;;  %s11_s20 = int_to_ptr.vmem [resolvable:$true] %s10_s20 }
   0x2   :  { %s747_s21 = scalar_lea.vmem %s11_s20, 16  ;;  %p752_p1 = scmp.lt.s32.totalorder %s11_s20, %s11_s20 }
   0x3   :  { %p748_p0 = scmp.ne.s32.totalorder %s11_s20, %s747_s21  ;;  %p753_p2 = scmp.lt.s32.totalorder %s747_s21, %s747_s21 }
   0x5   :  { %p754_p3 = por %p753_p2, %p752_p1 }
   0x7   :  { %p755_p4 = pnand %p754_p3, %p748_p0 }
   0x9   :  { %758 = shalt.err (!%p755_p4)  }
   0xa   :  { %s825_s22 = smov [#allocation3]  }
   0xb   :  { %13 = dma.vmem_to_smem %s11_s20, 16, %s825_s22, [#allocation2] }
   0xc   :  { %803 = dma.done.wait [#allocation2], 16 }
   0xd   :  { %804 = vsyncadd [#allocation2], 4294967280 }
   0xe   :  { %15 = sfence }
   0xf   :  { %16 = vsyncpa [#allocation5], 0 }
  0x10   :  { %18 = vsyncpa [#allocation5 + $0x1], 0  ;;  %s862_s23 = smov 0   ;;  %s864_s24 = smov 0  }
  0x11   :  { %s866_s0 = smov 0   ;;  %s868_s25 = smov 0  }
  0x12 LB: > { %s883_s26 = sadd.s32 4294967295, %s823_s25   ;;  %s621_s27 = sadd.s32 4294967294, %s823_s25   ;;  %s823_s25 = sphi %s868_s25, %s1009_s25   ;;  %s819_s0 = sphi %s866_s0, %s1008_s0   ;;  %s815_s24 = sphi %s864_s24, %s1007_s24   ;;  %s811_s23 = sphi %s862_s23, %s1006_s23  }
  0x13   : > { %s887_s28 = sadd.s32 1, %s823_s25   ;;  %s120_s29 = sadd.s32 1, %s819_s0 }
  0x14   : > { %s117_s30 = ssub.s32 %s823_s25, %s887_s28  ;;  %p130_p5 = scmp.ne.s32.totalorder %s819_s0, %s815_s24 }
  0x15   : > { %p118_p6 = scmp.eq.s32.totalorder %s117_s30, 0  ;;  %p131_p7 = scmp.eq.s32.totalorder %s883_s26, 1 }
  0x16   : > { %p136_p8 = scmp.ne.s32.totalorder %s815_s24, %s811_s23  ;;  %p137_p9 = scmp.eq.s32.totalorder %s621_s27, 1 }
  0x17   : > { %s898_s6 = scalar_select %p118_p6, %s819_s0, %s120_s29  }
  0x18   : > { %p900_p10 = por %p131_p7, %p130_p5  ;;  %p904_p11 = por %p137_p9, %p136_p8 }
  0x19   : > { %p624_p12 = scmp.ge.s32.totalorder %s823_s25, 1  ;;  %p172_p13 = scmp.lt.s32.totalorder %s823_s25, 3 }
  0x1b   : > { %p173_p0 = pnand %p624_p12, %p172_p13 }
  0x1c   : > { %v726_v0 = vld [vmem:[%s1001_s3] sm:$0xff] (!%p173_p0)   ;;  %p198_p1 = scmp.lt.s32.totalorder (!%p173_p0), %s883_s26, 1  ;;  %vm223_vm0 = vsmask.f32 (!%p173_p0), 7424  ;;  %vm245_vm1 = vcmask (!%p173_p0), 130048   ;;  %v732_v17 = vld [vmem:[%s1002_s4 + $0x8] sm:$0xff] (!%p173_p0)   ;;  %v442_v34 = vlaneseq (!%p173_p0) }
  0x1d   : > { %176 = sbr.rel (%p173_p0) target bundleno = 733 (0x2dd), region = 36  ;;  %v730_v1 = vld [vmem:[%s1000_s2] sm:$0xff] (!%p173_p0)   ;;  %659 = vmatprep.subr.bf16.mxu0 (!%p173_p0), %v726_v0  ;;  %vm381_vm2 = vcmask (!%p173_p0), 261120   ;;  %s932_s22 = sld [smem:[#allocation3 + %s883_s26]] (!%p173_p0)  ;;  %vm542_vm8 = vcmask (!%p173_p0), 195584  }
  0x1e   : > { %660 = vmatpush3.bf16.msra.mxu0 (!%p173_p0), %v726_v0  ;;  %v731_v16 = vld [vmem:[%s1002_s4] sm:$0xff] (!%p173_p0)   ;;  %v443_v35 = vshrl.u32 (!%p173_p0), %v442_v34, 7  ;;  %s195_s30 = sand.u32 (!%p173_p0), 1, %s815_s24   ;;  %s648_s12 = sshll.u32 (!%p173_p0), %s883_s26, 8 }
  0x1f   : > { %665 = vmatprep.subr.bf16.mxu0 (!%p173_p0), %v730_v1  ;;  %671 = vmatprep.subr.bf16.mxu1 (!%p173_p0), %v731_v16  ;;  %s625_s9 = sshll.u32 (!%p173_p0), %s195_s30, 4  ;;  %s955_s15 = scalar_lea.hbm (!%p173_p0), %s1003_s5, %s648_s12 }
  0x20   : > { %672 = vmatpush3.bf16.msra.mxu1 (!%p173_p0), %v731_v16  ;;  %v444_v37 = vadd.s32 (!%p173_p0), 8, %v443_v35  ;;  %v445_v38 = vadd.s32 (!%p173_p0), 16, %v443_v35  ;;  %s197_s10 = scalar_lea.vmem (!%p173_p0), [#allocation4], %s625_s9  ;;  %s957_s16 = scalar_lea.sflag (!%p173_p0), [#allocation5], %s195_s30 }
  0x21   : > { %673 = vmatprep.subr.bf16.mxu1 (!%p173_p0), %v732_v17  ;;  %s559_s11 = sshll.u32 (!%p173_p0), %s197_s10, 4  ;;  %s950_s11 = int_to_ptr.vmem [resolvable:$true] %s559_s11 }
  0x23   : > { %v446_v36 = vstv (!%p173_p0), %s932_s22  ;;  %s450_s27 = scvt.s32.f32 (!%p173_p0), %s932_s22 }
  0x24   : > { %s199_s13 = scalar_select %p198_p1, %s883_s26, 1  ;;  %674 = vmatpush3.bf16.msra.mxu1 %v732_v17  ;;  %vm447_vm3 = vcmp.lt.s32.totalorder %v443_v35, %v446_v36  ;;  %vm448_vm4 = vcmp.lt.s32.totalorder %v444_v37, %v446_v36  ;;  %vm449_vm5 = vcmp.lt.s32.totalorder %v445_v38, %v446_v36 }
  0x25   : > { %v471_v51 = vstv %s450_s27  ;;  %s641_s29 = sadd.f32 -1.0, %s450_s27  ;;  %s826_s26 = smov [#allocation4]  }
  0x26   : > { %s647_s14 = sshll.u32 %s199_s13, 4  ;;  %s763_s18 = sshll.u32 %s826_s26, 4  ;;  %s764_s18 = int_to_ptr.vmem [resolvable:$false] %s763_s18 }
  0x27   : > { %s202_s17 = scalar_lea.vmem %s999_s1, %s647_s14  ;;  %s765_s19 = scalar_lea.vmem %s764_s18, 512 }
  0x28   : > { %v207_v2 = vld [vmem:[%s202_s17 + $0x8] sm:$0xf]  ;;  %v208_v3 = vld [vmem:[%s202_s17 + $0xc] sm:$0x1]  ;;  %v727_v4 = vld [vmem:[%s202_s17] sm:$0xff]   ;;  %s759_s17 = scalar_lea.vmem %s950_s11, 256  ;;  %p766_p5 = scmp.lt.s32.totalorder %s950_s11, %s764_s18 }
  0x29   : > { %v629_v5 = vcombine.low %v207_v2, %v208_v3  ;;  %v225_v6 = vshrl.u32 %v727_v4, 16  ;;  %v227_v7 = vshll.u32 %v727_v4, 16  ;;  %v633_v15 = vcombine.low %v207_v2, %v207_v2  ;;  %p760_p2 = scmp.ne.s32.totalorder %s950_s11, %s759_s17  ;;  %p767_p6 = scmp.lt.s32.totalorder %s765_s19, %s759_s17 }
  0x2b   : > { %v232_v8 = vshll.u32 %v629_v5, 16  ;;  %v236_v9 = vshrl.u32 %v629_v5, 16  ;;  %v229_v10 = vrot.slane %v227_v7, 1  ;;  %p761_p3 = pnand %p760_p2, %p900_p10  ;;  %p768_p7 = por %p767_p6, %p766_p5 }
  0x2d   : > { %v234_v11 = vrot.slane %v232_v8, 1  ;;  %v230_v12 = vor.u32 %v229_v10, %v225_v6  ;;  %v495_v10 = vstv %s641_s29  ;;  %p762_p4 = pneg %p761_p3 }
  0x2f   : > { %v238_v13 = vor.u32 %v236_v9, %v234_v11  ;;  %v235_v14 = vsel %vm223_vm0, %v230_v12, %v234_v11  ;;  %p769_p8 = pnand %p768_p7, %p762_p4 }
  0x30   : > { %661 = vmatprep.mubr.msk.bf16.mxu0 %vm245_vm1, %v235_v14 }
  0x31   : > { %662 = vmatmul.mubr.msk.bf16.vlgmr.msra.gmra.mrb[0].mxu0 %vm245_vm1, %v238_v13 }
  0x32   : > { %666 = vmatpush3.bf16.msra.mxu0 %v730_v1  ;;  %667 = vmatprep.mubr.msk.bf16.mxu0 %vm245_vm1, %v727_v4 }
  0x3d   : > { %668 = vmatmul.mubr.msk.bf16.vlgmr.msra.gmra.mrb[0].mxu0 %vm245_vm1, %v633_v15 }
 0x110   : > { %v669_v18 = vpop.f32.mrb[0].mxu0 }
 0x111   : > { %v346_v19 = vpop.f32.mrb[1].mxu0  ;;  %v362_v21 = vmul.f32 %v669_v18, %v669_v18 }
 0x112   : > { %v670_v20 = vpop.f32.mrb[2].mxu0  ;;  %v360_v23 = vmul.f32 %v346_v19, %v346_v19 }
 0x113   : > { %v349_v22 = vpop.f32.mrb[3].mxu0  ;;  %v364_v26 = vpack.c.bf16 %v362_v21, %v362_v21 }
 0x114   : > { %v361_v24 = vmul.f32 %v349_v22, %v349_v22 }
 0x116   : > { %v363_v25 = vpack.c.bf16 %v361_v24, %v360_v23 }
 0x118   : > { %675 = vmatprep.mubr.msk.bf16.mxu1 %vm381_vm2, %v363_v25 }
 0x119   : > { %676 = vmatmul.mubr.msk.bf16.vlgmr.msra.gmra.mrb[0].mxu1 %vm381_vm2, %v364_v26 }
 0x1ec   : > { %v677_v27 = vpop.f32.mrb[0].mxu1 }
 0x1ed   : > { %v431_v28 = vadd.f32 1e-20, %v677_v27  ;;  %v422_v29 = vpop.f32.mrb[1].mxu1 }
 0x1ee   : > { %v423_v30 = vadd.f32 1e-20, %v422_v29  ;;  %v678_v31 = vpop.f32.mrb[2].mxu1 }
 0x1ef   : > { %733 = vlog2.f32 %v431_v28  ;;  %v425_v32 = vpop.f32.mrb[3].mxu1 }
 0x1f0   : > { %735 = vlog2.f32 %v423_v30  ;;  %v426_v33 = vadd.f32 1e-20, %v425_v32 }
 0x1f2   : > { %737 = vlog2.f32 %v426_v33 }
 0x1f3   : > { %739 = vrcp.f32 %v471_v51 }
 0x1f4   : > { %741 = vrcp.f32 %v495_v10 }
 0x1f9   : > { %v734_v39 = vpop.eup %733 }
 0x1fa   : > { %v736_v40 = vpop.eup %735  ;;  %v441_v41 = vmul.f32 0.6931472, %v734_v39 }
 0x1fb   : > { %v437_v42 = vmul.f32 0.6931472, %v736_v40 }
 0x1fc   : > { %v738_v43 = vpop.eup %737  ;;  %v459_v47 = vsel %vm449_vm5, %v441_v41, 0.0 }
 0x1fd   : > { %v439_v44 = vmul.f32 0.6931472, %v738_v43  ;;  %v457_v45 = vsel %vm447_vm3, %v437_v42, 0.0  ;;  %v463_v52 = vsel %vm245_vm1, %v459_v47, 0.0  ;;  %v740_v59 = vpop.eup %739 }
 0x1fe   : > { %v460_v48 = vsel %vm245_vm1, %v457_v45, 0.0  ;;  %v742_v18 = vpop.eup %741 }
 0x1ff   : > { %v458_v46 = vsel %vm448_vm4, %v439_v44, 0.0 }
 0x200   : > { %v461_v49 = vsel %vm245_vm1, %v458_v46, 0.0 }
 0x201   : > { %v462_v50 = vadd.f32 %v461_v49, %v460_v48 }
 0x203   : > { %v464_v53 = vadd.f32 %v463_v52, %v462_v50 }
 0x205   : > { %v465_v54 = vrot.slane %v464_v53, 4 }
 0x207   : > { %v466_v55 = vadd.f32 %v465_v54, %v464_v53 }
 0x209   : > { %v467_v56 = vrot.slane %v466_v55, 2 }
 0x20b   : > { %v468_v57 = vadd.f32 %v467_v56, %v466_v55 }
 0x20d   : > { %v469_v58 = vrot.slane %v468_v57, 1 }
 0x20f   : > { %v470_v60 = vadd.f32 %v469_v58, %v468_v57 }
 0x211   : > { %v473_v61 = vmul.f32 %v740_v59, %v470_v60 }
 0x213   : > { %v474_v62 = vsub.f32 %v437_v42, %v473_v61  ;;  %v475_v63 = vsub.f32 %v439_v44, %v473_v61  ;;  %v476_v0 = vsub.f32 %v441_v41, %v473_v61 }
 0x215   : > { %v477_v1 = vsel %vm447_vm3, %v474_v62, 0.0  ;;  %v478_v2 = vsel %vm448_vm4, %v475_v63, 0.0  ;;  %v479_v3 = vsel %vm449_vm5, %v476_v0, 0.0 }
 0x216   : > { %v480_v4 = vmul.f32 %v477_v1, %v477_v1  ;;  %v481_v5 = vmul.f32 %v478_v2, %v478_v2  ;;  %v482_v6 = vmul.f32 %v479_v3, %v479_v3 }
 0x218   : > { %v483_v7 = vsel %vm245_vm1, %v480_v4, 0.0  ;;  %v484_v8 = vsel %vm245_vm1, %v481_v5, 0.0  ;;  %v486_v11 = vsel %vm245_vm1, %v482_v6, 0.0 }
 0x219   : > { %v485_v9 = vadd.f32 %v484_v8, %v483_v7 }
 0x21b   : > { %v487_v12 = vadd.f32 %v486_v11, %v485_v9 }
 0x21d   : > { %v488_v13 = vrot.slane %v487_v12, 4 }
 0x21f   : > { %v489_v14 = vadd.f32 %v488_v13, %v487_v12 }
 0x221   : > { %v490_v15 = vrot.slane %v489_v14, 2 }
 0x223   : > { %v491_v16 = vadd.f32 %v490_v15, %v489_v14 }
 0x225   : > { %v492_v17 = vrot.slane %v491_v16, 1 }
 0x227   : > { %v493_v19 = vadd.f32 %v492_v17, %v491_v16 }
 0x229   : > { %v497_v20 = vmul.f32 %v742_v18, %v493_v19 }
 0x22b   : > { %743 = vrsqrt.f32 %v497_v20  ;;  %vm500_vm6 = vcmp.eq.f32.partialorder %v497_v20, inf  ;;  %v503_v23 = vand.u32 2147483648, %v497_v20  ;;  %vm502_vm7 = vcmp.eq.f32.partialorder %v497_v20, 0.0 }
 0x235   : > { %v744_v21 = vpop.eup %743 }
 0x236   : > { %v499_v22 = vmul.f32 %v744_v21, %v497_v20 }
 0x238   : > { %v501_v24 = vsel %vm500_vm6, %v497_v20, %v499_v22 }
 0x239   : > { %v504_v25 = vsel %vm502_vm7, %v503_v23, %v501_v24 }
 0x23a   : > { %v505_v26 = vadd.f32 1e-05, %v504_v25 }
 0x23c   : > { %745 = vrcp.f32 %v505_v26 }
 0x246   : > { %v746_v27 = vpop.eup %745 }
 0x247   : > { %v507_v28 = vmul.f32 %v746_v27, %v477_v1  ;;  %v508_v29 = vmul.f32 %v746_v27, %v478_v2  ;;  %v509_v30 = vmul.f32 %v746_v27, %v479_v3 }
 0x249   : > { %510 = vxpose.xlu0.b32.start [1/3] (short) (narrow) %v507_v28, 16 }
 0x24d   : > { %511 = vxpose.xlu0.b32.cont [2/3] (short) (narrow) %v508_v29, 16 }
 0x251   : > { %512 = vxpose.xlu0.b32.end [3/3] (short) (narrow) %v509_v30, 16 }
 0x2c9   : > { %v526_v31 = vpop.trf.xlu0 }
 0x2ca   : > { %543 = vst.msk [vmem:[%s197_s10] sm:$0xff] %vm542_vm8, %v526_v31 }
 0x2cd   : > { %v527_v32 = vpop.trf.xlu0 }
 0x2ce   : > { %544 = vst.msk [vmem:[%s197_s10 + $0x8] sm:$0xff] %vm542_vm8, %v527_v32 }
 0x2cf   : > { %772 = shalt.err (!%p769_p8)
}
 0x2d0   : > { %s773_s20 = scalar_lea.hbm %s955_s15, 256  ;;  %s777_s27 = scalar_lea.hbm %s1003_s5, 512 }
 0x2d1   : > { %p774_p9 = scmp.ne.s32.totalorder %s955_s15, %s773_s20  ;;  %p778_p0 = scmp.lt.u32.totalorder %s955_s15, %s1003_s5 }
 0x2d2   : > { %p779_p1 = scmp.lt.u32.totalorder %s777_s27, %s773_s20  ;;  %p781_p3 = scmp.lt.u32.totalorder %s773_s20, %s955_s15 }
 0x2d3   : > { %p775_p12 = pnand %p774_p9, %p900_p10 }
 0x2d4   : > { %p780_p2 = por %p779_p1, %p778_p0 }
 0x2d5   : > { %p776_p13 = pneg %p775_p12 }
 0x2d6   : > { %p782_p4 = por %p781_p3, %p780_p2 }
 0x2d8   : > { %p783_p5 = pnand %p782_p4, %p776_p13 }
 0x2da   : > { %786 = shalt.err (!%p783_p5)
}
 0x2db   : > { %s827_s9 = smov 128   ;;  %s828_s10 = smov 8  }
 0x2dc   : > { %683 = dma.vmem_to_hbm [thread:$0]  (%p900_p10), %s950_s11, 256, %s955_s15, %s957_s16, %s827_s9, %s827_s9, %s828_s10  }
 0x2dd PF: > { %p689_p6 = scmp.ge.s32.totalorder %s823_s25, 2  ;;  %s574_s12 = sand.u32 1, %s811_s23  }
 0x2de   : > { %s575_s13 = scalar_lea.sflag [#allocation5], %s574_s12 }
 0x2df   : > { %p686_p7 = pnand %p689_p6, %p904_p11 }
 0x2e1   : > { %806 = dma.done.wait (!%p686_p7), %s575_s13, 256  }
 0x2e2   : > { %808 = vsyncadd (!%p686_p7), %s575_s13, 4294967040  ;;  %p21_p8 = scmp.ge.s32.totalorder %s887_s28, 4   ;;  %s1006_s23 = smov %s815_s24 }
 0x2e3   : > { %s1007_s24 = smov %s819_s0  ;;  %s1008_s0 = smov %s898_s6 }
 0x2e4   : > { %s1009_s25 = smov %s887_s28  ;;  %23 = sbr.rel (!%p21_p8) target bundleno = 18 (0x12), region = 71 }
 0x2eb   :  { %580 = vsyncpa [#allocation5], 1 }
 0x2ec   :  { %582 = vsyncpa [#allocation5 + $0x1], 1 }

</bundles_post_ra>
